<compile_context>
chip_gen: v7x
topology: tpu7x:2x2x1
jax: 0.10.0
libtpu: 0.0.40
codegen_flags: <defaults>
</compile_context>

<pallas_src>
import functools

import jax
import jax.numpy as jnp
from jax import lax
from jax.experimental import pallas as pl
from jax.experimental.pallas import tpu as pltpu


# Finite, most-negative f32.  Do NOT "improve" this to -inf: fully masked rows
# rely on exp(0) = 1 -> lse = log(C) staying finite (their loss is zeroed via
# t = 0), and -inf would give inf * 0 = NaN.
_F32_NEG = float(jnp.finfo(jnp.float32).min)


def _round_up(a, b):
    return (a + b - 1) // b * b


# ---------------------------------------------------------------------------
# Kernels
# ---------------------------------------------------------------------------

def _soft_xent_kernel(x_ref, t_ref, o_ref, *, n_rows, block_rows):
    """One (TM, C) row tile -> one lane-dense (1, 8, 128) partial-sum block.

    Tail rows (>= n_rows) of the last tile carry unspecified data; they are
    masked (x -> f32 min, t -> 0) BEFORE the max / exp / sum reductions.
    """
    i = pl.program_id(0)
    rows_left = n_rows - i * block_rows
    row_ids = lax.broadcasted_iota(jnp.int32, (block_rows, 1), 0)
    valid = row_ids < rows_left                                    # (TM, 1)

    # NOTE: f32 compute keeps things simple/robust; on v6e/v7x a bf16-native
    # elementwise path would shave some VMEM, but the kernel is DMA-bound.
    x = jnp.where(valid, x_ref[...].astype(jnp.float32), _F32_NEG)
    t = jnp.where(valid, t_ref[...].astype(jnp.float32), 0.0)

    m = jnp.max(x, axis=-1, keepdims=True)                         # (TM, 1)
    xc = x - m                                                     # centered logits (reused)
    lse = jnp.log(jnp.sum(jnp.exp(xc), axis=-1, keepdims=True))    # (TM, 1)

    t_sum = jnp.sum(t, axis=-1, keepdims=True)                     # (TM, 1)
    tx = jnp.sum(t * xc, axis=-1, keepdims=True)                   # centered -> no cancellation
    row_loss = lse * t_sum - tx                                    # (TM, 1)

    o_ref[...] = jnp.full(o_ref.shape, jnp.sum(row_loss), dtype=o_ref.dtype)


def _soft_xent_kernel_ct(x_ref, t_ref, o_ref, m_sc, l_sc, ts_sc, tx_sc, *,
                         n_rows, n_cols, block_rows, block_cols):
    """Class-tiled variant: (TM, TC) tile, class axis is an online reduction.

    Running per-row state in VMEM scratch:
      m_sc  : running max
      l_sc  : running sum exp(x - m)
      ts_sc : running sum t
      tx_sc : running sum t * (x - m)   (rebased whenever m grows)
    """
    i = pl.program_id(0)
    k = pl.program_id(1)

    @pl.when(k == 0)
    def _():
        m_sc[...] = jnp.full_like(m_sc, _F32_NEG)
        l_sc[...] = jnp.zeros_like(l_sc)
        ts_sc[...] = jnp.zeros_like(ts_sc)
        tx_sc[...] = jnp.zeros_like(tx_sc)

    rows_left = n_rows - i * block_rows
    cols_left = n_cols - k * block_cols
    row_ids = lax.broadcasted_iota(jnp.int32, (block_rows, block_cols), 0)
    col_ids = lax.broadcasted_iota(jnp.int32, (block_rows, block_cols), 1)
    valid = (row_ids < rows_left) & (col_ids < cols_left)

    x = jnp.where(valid, x_ref[...].astype(jnp.float32), _F32_NEG)
    t = jnp.where(valid, t_ref[...].astype(jnp.float32), 0.0)

    m_old = m_sc[...]
    m_new = jnp.maximum(m_old, jnp.max(x, axis=-1, keepdims=True))
    alpha = jnp.exp(m_old - m_new)
    xc = x - m_new
    l_sc[...] = alpha * l_sc[...] + jnp.sum(jnp.exp(xc), axis=-1, keepdims=True)
    # Rebase the running sum(t*(x - m)) to the new max, then add this block.
    # The where() keeps masked lanes from contributing (t there is already 0).
    tx_sc[...] = (tx_sc[...] + (m_old - m_new) * ts_sc[...]
                  + jnp.sum(jnp.where(valid, t * xc, 0.0), axis=-1, keepdims=True))
    ts_sc[...] = ts_sc[...] + jnp.sum(t, axis=-1, keepdims=True)
    m_sc[...] = m_new

    @pl.when(k == pl.num_programs(1) - 1)
    def _():
        lse = jnp.log(l_sc[...])
        row_loss = lse * ts_sc[...] - tx_sc[...]
        o_ref[...] = jnp.full(o_ref.shape, jnp.sum(row_loss), dtype=o_ref.dtype)


# ---------------------------------------------------------------------------
# Tile sizing (VMEM- and generation-aware)
# ---------------------------------------------------------------------------

def _vmem_capacity_bytes():
    try:
        return int(pltpu.get_tpu_info().vmem_capacity_bytes)
    except Exception:
        return 64 << 20   # conservative: v7x per-TensorCore VMEM


def _choose_row_block_single(n, c, elem_bytes, budget_bytes):
    if n <= 8:
        return max(1, n)                 # full-row block (exempt from the 8-sublane rule)
    row_in_bytes = c * elem_bytes
    # Worst-case VMEM/row: 2 inputs x 2 pipeline buffers + ~4 f32 full-width temps.
    per_row_vmem = 4 * row_in_bytes + 4 * c * 4
    tm = (4 << 20) // max(1, row_in_bytes)          # ~4 MiB of input per tile per input
    tm = min(tm, budget_bytes // max(1, per_row_vmem), 4096)
    tm = min(tm, pl.cdiv(n, 4))                     # >=4 grid steps: pipeline + v7x 2 TCs
    return max(8, (tm // 8) * 8)


def _choose_blocks_class_tiled(n, c, elem_bytes, budget_bytes):
    tc = c if c <= 2048 else 2048                   # class tile (full dim if it fits one block)
    per_row_vmem = 4 * tc * elem_bytes + 4 * tc * 4 + 16
    tm = (2 << 20) // max(1, tc * elem_bytes)       # ~2 MiB of input per tile per input
    tm = min(tm, budget_bytes // max(1, per_row_vmem), 1024)
    if n > 8:
        tm = min(tm, pl.cdiv(n, 4))
        tm = max(8, (tm // 8) * 8)
    else:
        tm = max(1, n)
    return tm, tc


# ---------------------------------------------------------------------------
# pallas_call runners + public wrapper
# ---------------------------------------------------------------------------

def _run_single_block(x, target, *, block_rows, vmem_limit):
    n, c = x.shape
    grid_m = pl.cdiv(n, block_rows)
    kernel = functools.partial(_soft_xent_kernel, n_rows=n, block_rows=block_rows)
    partial_sums = pl.pallas_call(
        kernel,
        out_shape=jax.ShapeDtypeStruct((grid_m, 8, 128), jnp.float32),
        grid_spec=pltpu.PrefetchScalarGridSpec(
            num_scalar_prefetch=0,
            grid=(grid_m,),
            in_specs=[
                pl.BlockSpec((block_rows, c), lambda i: (i, 0)),
                pl.BlockSpec((block_rows, c), lambda i: (i, 0)),
            ],
            out_specs=pl.BlockSpec((1, 8, 128), lambda i: (i, 0, 0)),
        ),
        compiler_params=pltpu.CompilerParams(
            dimension_semantics=("parallel",),
            vmem_limit_bytes=int(vmem_limit),
        ),
    )(x, target)
    return jnp.sum(partial_sums[:, 0, 0]) / jnp.float32(n)


def _run_class_tiled(x, target, *, block_rows, block_cols, vmem_limit):
    n, c = x.shape
    grid_m = pl.cdiv(n, block_rows)
    grid_k = pl.cdiv(c, block_cols)
    kernel = functools.partial(_soft_xent_kernel_ct, n_rows=n, n_cols=c,
                               block_rows=block_rows, block_cols=block_cols)
    partial_sums = pl.pallas_call(
        kernel,
        out_shape=jax.ShapeDtypeStruct((grid_m, 8, 128), jnp.float32),
        grid_spec=pltpu.PrefetchScalarGridSpec(
            num_scalar_prefetch=0,
            grid=(grid_m, grid_k),
            in_specs=[
                pl.BlockSpec((block_rows, block_cols), lambda i, k: (i, k)),
                pl.BlockSpec((block_rows, block_cols), lambda i, k: (i, k)),
            ],
            out_specs=pl.BlockSpec((1, 8, 128), lambda i, k: (i, 0, 0)),
            scratch_shapes=[pltpu.VMEM((block_rows, 1), jnp.float32)] * 4,
        ),
        compiler_params=pltpu.CompilerParams(
            dimension_semantics=("parallel", "arbitrary"),
            vmem_limit_bytes=int(vmem_limit),
        ),
    )(x, target)
    return jnp.sum(partial_sums[:, 0, 0]) / jnp.float32(n)


def soft_target_cross_entropy(x, target):
    """Pallas implementation of SoftTargetCrossEntropy.forward(x, target).

    x, target: (N, C) float arrays (f32 or bf16). Returns a scalar f32 loss.
    """
    n, c = x.shape
    assert target.shape == (n, c), (x.shape, target.shape)
    elem_bytes = max(jnp.dtype(x.dtype).itemsize, jnp.dtype(target.dtype).itemsize)

    vmem_cap = _vmem_capacity_bytes()
    vmem_limit = max(16 << 20, min(vmem_cap * 3 // 4, 48 << 20))   # <= 48 MiB (v7x headroom)
    budget = max(4 << 20, vmem_limit - (8 << 20))                  # sizing margin

    # Can we afford full-C row tiles of a useful height?
    per_row_full = 4 * c * elem_bytes + 4 * c * 4
    tm_budget = (budget // per_row_full // 8) * 8
    if c <= 2048 or tm_budget >= 64 or tm_budget >= _round_up(n, 8):
        tm = _choose_row_block_single(n, c, elem_bytes, budget)
        return _run_single_block(x, target, block_rows=tm, vmem_limit=vmem_limit)

    # Vocab-scale C: class-tiled online-LSE path keeps VMEM flat.
    tm, tc = _choose_blocks_class_tiled(n, c, elem_bytes, budget)
    return _run_class_tiled(x, target, block_rows=tm, block_cols=tc,
                            vmem_limit=vmem_limit)


# ---------------------------------------------------------------------------
# Self-test
# ---------------------------------------------------------------------------

def _reference(x, target):
    logp = jax.nn.log_softmax(x.astype(jnp.float32), axis=-1)
    return jnp.mean(jnp.sum(-target.astype(jnp.float32) * logp, axis=-1))


if __name__ == "__main__":
    key = jax.random.PRNGKey(0)

    def _make(k, n, c, dtype=jnp.float32):
        k1, k2 = jax.random.split(k)
        xx = jax.random.normal(k1, (n, c), dtype=jnp.float32)
        tt = jax.nn.softmax(jax.random.normal(k2, (n, c), dtype=jnp.float32), axis=-1)
        return xx.astype(dtype), tt.astype(dtype)

    # 1) Aligned shapes, f32, multiple row tiles on the single-block path.
    k, key = jax.random.split(key)
    x, t = _make(k, 32, 128)
    loss = soft_target_cross_entropy(x, t)
    jax.block_until_ready(loss)
    ref = _reference(x, t)
    assert jnp.allclose(loss, ref, atol=1e-5, rtol=1e-5), (loss, ref)

    # 2) Ragged rows and ragged class dim — handled in-kernel, no HBM padding.
    k, key = jax.random.split(key)
    x, t = _make(k, 10, 257)
    loss = soft_target_cross_entropy(x, t)
    jax.block_until_ready(loss)
    ref = _reference(x, t)
    assert jnp.allclose(loss, ref, atol=1e-5, rtol=1e-5), (loss, ref)

    # 3) bf16 inputs (halves HBM traffic; kernel upcasts internally).
    k, key = jax.random.split(key)
    x, t = _make(k, 32, 128, dtype=jnp.bfloat16)
    loss = soft_target_cross_entropy(x, t)
    jax.block_until_ready(loss)
    ref = _reference(x, t)
    assert jnp.allclose(loss, ref, atol=1e-2, rtol=1e-2), (loss, ref)

    # 4) Class-tiled online-LSE path (used for vocab-scale C), forced small
    #    tiles so both the ragged-row and ragged-class masks are exercised.
    k, key = jax.random.split(key)
    x, t = _make(k, 12, 300)
    loss = _run_class_tiled(x, t, block_rows=8, block_cols=128,
                            vmem_limit=32 * 1024 * 1024)
    jax.block_until_ready(loss)
    ref = _reference(x, t)
    assert jnp.allclose(loss, ref, atol=1e-5, rtol=1e-5), (loss, ref)

    print("KERNEL_OK")
</pallas_src>

<mosaic_0001>
module attributes {stable_mosaic.version = 11 : i64} {
  func.func @_soft_xent_kernel(%arg0: i32, %arg1: memref<8x128xf32, #tpu.memory_space<vmem>>, %arg2: memref<8x128xf32, #tpu.memory_space<vmem>>, %arg3: memref<1x8x128xf32, #tpu.memory_space<vmem>>) attributes {dimension_semantics = [#tpu.dimension_semantics<parallel>], iteration_bounds = array<i64: 4>, scalar_prefetch = 0 : i64, scratch_operands = 0 : i64, tpu.core_type = #tpu.core_type<tc>, window_params = [{transform_indices = @transform_0, window_bounds = array<i64: 8, 128>}, {transform_indices = @transform_1, window_bounds = array<i64: 8, 128>}, {transform_indices = @transform_2, window_bounds = array<i64: 1, 8, 128>}]} {
    %c8_i32 = arith.constant 8 : i32
    %0 = arith.muli %arg0, %c8_i32 : i32
    %c32_i32 = arith.constant 32 : i32
    %1 = arith.subi %c32_i32, %0 : i32
    %2 = tpu.iota {dimensions = array<i32: 0>} : vector<8x1xi32>
    %3 = vector.broadcast %1 : i32 to vector<8x1xi32>
    %4 = arith.cmpi slt, %2, %3 : vector<8x1xi32>
    %c0 = arith.constant 0 : index
    %c0_0 = arith.constant 0 : index
    %5 = vector.load %arg1[%c0, %c0_0] : memref<8x128xf32, #tpu.memory_space<vmem>>, vector<8x128xf32>
    %cst = arith.constant -3.40282347E+38 : f32
    %6 = vector.shape_cast %4 : vector<8x1xi1> to vector<8x1xi1>
    %7 = vector.broadcast %6 : vector<8x1xi1> to vector<8x128xi1>
    %8 = vector.broadcast %cst : f32 to vector<8x128xf32>
    %9 = arith.select %7, %5, %8 : vector<8x128xi1>, vector<8x128xf32>
    %c0_1 = arith.constant 0 : index
    %c0_2 = arith.constant 0 : index
    %10 = vector.load %arg2[%c0_1, %c0_2] : memref<8x128xf32, #tpu.memory_space<vmem>>, vector<8x128xf32>
    %cst_3 = arith.constant 0.000000e+00 : f32
    %11 = vector.shape_cast %4 : vector<8x1xi1> to vector<8x1xi1>
    %12 = vector.broadcast %11 : vector<8x1xi1> to vector<8x128xi1>
    %13 = vector.broadcast %cst_3 : f32 to vector<8x128xf32>
    %14 = arith.select %12, %10, %13 : vector<8x128xi1>, vector<8x128xf32>
    %cst_4 = arith.constant dense<0xFF800000> : vector<8xf32>
    %15 = vector.multi_reduction <maximumf>, %9, %cst_4 [1] : vector<8x128xf32> to vector<8xf32>
    %16 = vector.shape_cast %15 : vector<8xf32> to vector<8x1xf32>
    %17 = vector.broadcast %16 : vector<8x1xf32> to vector<8x128xf32>
    %18 = arith.subf %9, %17 : vector<8x128xf32>
    %19 = math.exp %18 : vector<8x128xf32>
    %cst_5 = arith.constant dense<0.000000e+00> : vector<8xf32>
    %20 = vector.multi_reduction <add>, %19, %cst_5 [1] : vector<8x128xf32> to vector<8xf32>
    %21 = vector.shape_cast %20 : vector<8xf32> to vector<8x1xf32>
    %22 = math.log %21 : vector<8x1xf32>
    %cst_6 = arith.constant dense<0.000000e+00> : vector<8xf32>
    %23 = vector.multi_reduction <add>, %14, %cst_6 [1] : vector<8x128xf32> to vector<8xf32>
    %24 = vector.shape_cast %23 : vector<8xf32> to vector<8x1xf32>
    %25 = arith.mulf %14, %18 : vector<8x128xf32>
    %cst_7 = arith.constant dense<0.000000e+00> : vector<8xf32>
    %26 = vector.multi_reduction <add>, %25, %cst_7 [1] : vector<8x128xf32> to vector<8xf32>
    %27 = vector.shape_cast %26 : vector<8xf32> to vector<8x1xf32>
    %28 = arith.mulf %22, %24 : vector<8x1xf32>
    %29 = arith.subf %28, %27 : vector<8x1xf32>
    %30 = vector.shape_cast %29 : vector<8x1xf32> to vector<1x8x1xf32>
    %cst_8 = arith.constant dense<0.000000e+00> : vector<1xf32>
    %31 = vector.multi_reduction <add>, %30, %cst_8 [1, 2] : vector<1x8x1xf32> to vector<1xf32>
    %32 = vector.shape_cast %31 : vector<1xf32> to vector<1x1x1xf32>
    %33 = vector.extract %32[0, 0, 0] : f32 from vector<1x1x1xf32>
    %34 = vector.broadcast %33 : f32 to vector<1x8x128xf32>
    %c0_9 = arith.constant 0 : index
    %c0_10 = arith.constant 0 : index
    %c0_11 = arith.constant 0 : index
    %35 = vector.load %arg3[%c0_9, %c0_10, %c0_11] : memref<1x8x128xf32, #tpu.memory_space<vmem>>, vector<1x8x128xf32>
    tpu.vector_store %arg3[%c0_9, %c0_10, %c0_11], %34 {strides = array<i32>} : memref<1x8x128xf32, #tpu.memory_space<vmem>>, vector<1x8x128xf32>,
    return
  }
  func.func @transform_0(%arg0: i32) -> (i32, i32) {
    %c0_i32 = arith.constant 0 : i32
    %c0_i32_0 = arith.constant 0 : i32
    return %arg0, %c0_i32 : i32, i32
  }
  func.func @transform_1(%arg0: i32) -> (i32, i32) {
    %c0_i32 = arith.constant 0 : i32
    %c0_i32_0 = arith.constant 0 : i32
    return %arg0, %c0_i32 : i32, i32
  }
  func.func @transform_2(%arg0: i32) -> (i32, i32, i32) {
    %c0_i32 = arith.constant 0 : i32
    %c0_i32_0 = arith.constant 0 : i32
    %c0_i32_1 = arith.constant 0 : i32
    return %arg0, %c0_i32, %c0_i32_0 : i32, i32, i32
  }
}

</mosaic_0001>

<bundles_post_ra>
// kernel: tpu_custom_call.1
= control target key start
LH: loop header
LB: loop body
LE: loop exit
PB: predicated region body
PF: predicated region fallthrough
CT: control target
= control target key end

     0   :  { %7 = vsyncpa [#allocation3], 0  ;;  %s780_s0 = inlined_call_operand.hbm [shape: f32[32,128], index: 0, kind: input, shape index: {}]   ;;  %s781_s1 = inlined_call_operand.hbm [shape: f32[32,128], index: 1, kind: input, shape index: {}]   ;;  %s782_s2 = inlined_call_operand.hbm [shape: f32[4,8,128], index: 2, kind: output, shape index: {}]  }
   0x1   :  { %9 = vsyncpa [#allocation3 + $0x1], 0 }
   0x2   :  { %10 = vsyncpa [#allocation6], 0 }
   0x3   :  { %12 = vsyncpa [#allocation6 + $0x1], 0 }
   0x4   :  { %13 = vsyncpa [#allocation4], 0 }
   0x5   :  { %15 = vsyncpa [#allocation4 + $0x1], 0  ;;  %s567_s9 = smov 0   ;;  %s569_s10 = smov 0  }
   0x6   :  { %s571_s11 = smov 0   ;;  %s573_s12 = smov 0  }
   0x7 LB: > { %s588_s13 = sadd.s32 4294967295, %s547_s12   ;;  %s344_s14 = sadd.s32 4294967294, %s547_s12   ;;  %s547_s12 = sphi %s573_s12, %s800_s12   ;;  %s543_s11 = sphi %s571_s11, %s799_s11   ;;  %s539_s10 = sphi %s569_s10, %s798_s10   ;;  %s535_s9 = sphi %s567_s9, %s797_s9  }
   0x8   : > { %s592_s15 = sadd.s32 1, %s547_s12   ;;  %s28_s16 = sadd.s32 1, %s543_s11 }
   0x9   : > { %s25_s17 = ssub.s32 %s547_s12, %s592_s15  ;;  %p35_p0 = scmp.ne.s32.totalorder %s543_s11, %s539_s10 }
   0xa   : > { %p26_p1 = scmp.eq.s32.totalorder %s25_s17, 0  ;;  %p36_p2 = scmp.eq.s32.totalorder %s547_s12, 0 }
   0xb   : > { %p41_p3 = scmp.ne.s32.totalorder %s539_s10, %s535_s9  ;;  %p42_p4 = scmp.eq.s32.totalorder %s588_s13, 0 }
   0xc   : > { %s604_s18 = scalar_select %p26_p1, %s543_s11, %s28_s16  }
   0xd   : > { %p606_p5 = por %p36_p2, %p35_p0  ;;  %p610_p6 = por %p42_p4, %p41_p3 }
   0xe   : > { %p91_p7 = scmp.eq.s32.totalorder %s588_s13, 3  ;;  %p97_p8 = scmp.eq.s32.totalorder %s344_s14, 3 }
   0xf   : > { %s786_s20 = scalar_select %p610_p6, 1, 0 }
  0x10   : > { %p379_p9 = scmp.lt.s32.totalorder %s547_s12, 4  ;;  %p616_p10 = por %p91_p7, %p35_p0 }
  0x11   : > { %p620_p11 = por %p97_p8, %p41_p3  ;;  %s625_s23 = sand.u32 1, %s543_s11  }
  0x12   : > { %s787_s21 = scalar_select %p616_p10, 1, 0 }
  0x13   : > { %s788_s22 = scalar_select %p620_p11, 1, 0 }
  0x14   : > { %s348_s24 = sshll.u32 %s547_s12, 7  ;;  %s347_s25 = sshll.u32 %s625_s23, 3 }
  0x15   : > { %s634_s28 = scalar_lea.hbm %s780_s0, %s348_s24  ;;  %s121_s29 = scalar_lea.vmem [#allocation2], %s347_s25 }
  0x16   : > { %s128_s30 = sshll.u32 %s121_s29, 4  ;;  %p640_p12 = pnand %p379_p9, %p606_p5  ;;  %s644_s30 = int_to_ptr.vmem [resolvable:$true] %s128_s30 }
  0x17   : > { %s118_s4 = scalar_lea.sflag [#allocation3], %s625_s23  ;;  %s417_s5 = scalar_lea.hbm %s634_s28, 128 }
  0x18   : > { %p418_p1 = scmp.ne.s32.totalorder %s634_s28, %s417_s5  ;;  %p419_p2 = pneg %p640_p12 }
  0x19   : > { %s422_s8 = scalar_lea.hbm %s780_s0, 512  ;;  %p423_p5 = scmp.lt.u32.totalorder %s634_s28, %s780_s0 }
  0x1a   : > { %p420_p3 = pnand %p419_p2, %p418_p1  ;;  %p424_p7 = scmp.lt.u32.totalorder %s422_s8, %s417_s5 }
  0x1b   : > { %p426_p9 = scmp.lt.u32.totalorder %s417_s5, %s634_s28 }
  0x1c   : > { %p421_p4 = pneg %p420_p3  ;;  %p425_p8 = por %p424_p7, %p423_p5 }
  0x1e   : > { %p427_p13 = por %p426_p9, %p425_p8 }
  0x20   : > { %p428_p0 = pnand %p427_p13, %p421_p4 }
  0x22   : > { %431 = shalt.err (!%p428_p0)
}
  0x23   : > { %s432_s17 = scalar_lea.vmem %s644_s30, 128  ;;  %s549_s19 = smov [#allocation2]  }
  0x24   : > { %p433_p1 = scmp.ne.s32.totalorder %s644_s30, %s432_s17  ;;  %s437_s26 = sshll.u32 %s549_s19, 4  ;;  %s438_s26 = int_to_ptr.vmem [resolvable:$false] %s437_s26 }
  0x25   : > { %s439_s27 = scalar_lea.vmem %s438_s26, 256  ;;  %p440_p10 = scmp.lt.s32.totalorder %s644_s30, %s438_s26 }
  0x26   : > { %p435_p3 = pnand %p433_p1, %p419_p2  ;;  %p441_p5 = scmp.lt.s32.totalorder %s439_s27, %s432_s17 }
  0x28   : > { %p436_p11 = pneg %p435_p3  ;;  %p442_p7 = por %p441_p5, %p440_p10 }
  0x2a   : > { %p443_p8 = pnand %p442_p7, %p436_p11 }
  0x2c   : > { %446 = shalt.err (!%p443_p8)
}
  0x2d   : > { %371 = dma.hbm_to_vmem [thread:$0]  (!%p640_p12), %s634_s28, 128, %s644_s30, %s118_s4  }
  0x2e   : > { %p790_p13 = scmp.lt.s32.totalorder %s547_s12, 5  ;;  %p791_p0 = scmp.ge.s32.totalorder %s547_s12, 1 }
  0x2f   : > { %s687_s7 = scalar_lea.hbm %s781_s1, %s348_s24  ;;  %s139_s8 = scalar_lea.vmem [#allocation5], %s347_s25 }
  0x30   : > { %p678_p4 = pnand %p791_p0, %p790_p13  ;;  %s146_s14 = sshll.u32 %s139_s8, 4  ;;  %s147_s14 = int_to_ptr.vmem [resolvable:$true] %s146_s14 }
  0x31   : > { %s136_s28 = scalar_lea.sflag [#allocation6], %s625_s23  ;;  %s447_s30 = scalar_lea.hbm %s687_s7, 128 }
  0x32   : > { %s792_s29 = scalar_select %p678_p4, 1, 0 }
  0x33   : > { %p448_p10 = scmp.ne.s32.totalorder %s687_s7, %s447_s30  ;;  %s452_s24 = scalar_lea.hbm %s781_s1, 512 }
  0x34   : > { %p453_p1 = scmp.lt.u32.totalorder %s687_s7, %s781_s1  ;;  %p454_p3 = scmp.lt.u32.totalorder %s452_s24, %s447_s30 }
  0x35   : > { %p450_p11 = pnand %p448_p10, %p419_p2  ;;  %p456_p7 = scmp.lt.u32.totalorder %s447_s30, %s687_s7 }
  0x36   : > { %p455_p5 = por %p454_p3, %p453_p1 }
  0x37   : > { %p451_p9 = pneg %p450_p11 }
  0x38   : > { %p457_p8 = por %p456_p7, %p455_p5 }
  0x3a   : > { %p458_p13 = pnand %p457_p8, %p451_p9 }
  0x3c   : > { %461 = shalt.err (!%p458_p13)
}
  0x3d   : > { %s462_s23 = scalar_lea.vmem %s147_s14, 128  ;;  %s550_s25 = smov [#allocation5]  }
  0x3e   : > { %p463_p0 = scmp.ne.s32.totalorder %s147_s14, %s462_s23  ;;  %s467_s26 = sshll.u32 %s550_s25, 4  ;;  %s468_s26 = int_to_ptr.vmem [resolvable:$false] %s467_s26 }
  0x3f   : > { %s469_s27 = scalar_lea.vmem %s468_s26, 256  ;;  %p470_p6 = scmp.lt.s32.totalorder %s147_s14, %s468_s26 }
  0x40   : > { %p465_p10 = pnand %p463_p0, %p419_p2  ;;  %p471_p4 = scmp.lt.s32.totalorder %s469_s27, %s462_s23 }
  0x42   : > { %p466_p11 = pneg %p465_p10  ;;  %p472_p1 = por %p471_p4, %p470_p6 }
  0x44   : > { %p473_p3 = pnand %p472_p1, %p466_p11 }
  0x46   : > { %476 = shalt.err (!%p473_p3)
}
  0x47   : > { %374 = dma.hbm_to_vmem [thread:$0]  (!%p640_p12), %s687_s7, 128, %s147_s14, %s136_s28  }
  0x48   : > { %p793_p9 = scmp.ne.s32.totalorder %s792_s29, 0 }
  0x49   : > { %s714_s5 = sand.u32 (!%p793_p9), 1, %s539_s10   ;;  %p794_p6 = scmp.ne.s32.totalorder (!%p793_p9), %s786_s20, 0 }
  0x4a   : > { %155 = sbr.rel (%p793_p9) target bundleno = 626 (0x272), region = 28  ;;  %s717_s6 = sshll.u32 (!%p793_p9), %s714_s5, 3 }
  0x4b   : > { %s158_s8 = scalar_lea.sflag (!%p793_p9), [#allocation3], %s714_s5  ;;  %s161_s30 = scalar_lea.vmem (!%p793_p9), [#allocation2], %s717_s6 }
  0x51   : > { %522 = dma.done.wait (%p794_p6), %s158_s8, 128  }
  0x52   : > { %524 = vsyncadd (%p794_p6), %s158_s8, 4294967168  ;;  %s167_s3 = scalar_lea.sflag [#allocation6], %s714_s5  ;;  %s170_s29 = scalar_lea.vmem [#allocation5], %s717_s6 }
  0x53   : > { %526 = dma.done.wait (%p794_p6), %s167_s3, 128  }
  0x54   : > { %528 = vsyncadd (%p794_p6), %s167_s3, 4294967168  ;;  %s355_s7 = sshll.u32 %s588_s13, 3  ;;  %v198_v0 = vlaneseq  ;;  %v202_v3 = vld [vmem:[%s161_s30] sm:$0xff]  ;;  %v206_v5 = vld [vmem:[%s170_s29] sm:$0xff]  ;;  %vm224_vm1 = vcmask 7168   ;;  %s195_s20 = scalar_lea.vmem [#allocation7], %s717_s6 }
  0x55   : > { %s197_s14 = ssub.s32 32, %s355_s7  ;;  %s251_s28 = sshll.u32 %s195_s20, 4  ;;  %s734_s28 = int_to_ptr.vmem [resolvable:$true] %s251_s28 }
  0x56   : > { %v199_v1 = vshrl.u32 %v198_v0, 7  ;;  %v200_v2 = vstv %s197_s14  ;;  %s357_s4 = sshll.u32 %s588_s13, 7  ;;  %s238_s23 = scalar_lea.sflag [#allocation4], %s714_s5 }
  0x57   : > { %s739_s19 = scalar_lea.hbm %s782_s2, %s357_s4  ;;  %s477_s25 = scalar_lea.vmem %s734_s28, 128 }
  0x58   : > { %vm201_vm0 = vcmp.lt.s32.totalorder %v199_v1, %v200_v2  ;;  %p478_p12 = scmp.ne.s32.totalorder %s734_s28, %s477_s25  ;;  %p795_p2 = scmp.ne.s32.totalorder %s787_s21, 0 }
  0x59   : > { %v205_v4 = vsel %vm201_vm0, %v202_v3, -3.4028235e+38  ;;  %v207_v6 = vsel %vm201_vm0, %v206_v5, 0.0  ;;  %s551_s13 = smov [#allocation7]  }
  0x5a   : > { %208 = vmax.xlane.f32.xlu0 %v205_v4  ;;  %217 = vadd.xlane.f32.xlu1 %v207_v6  ;;  %p479_p4 = pnand %p478_p12, %p795_p2  ;;  %s481_s26 = sshll.u32 %s551_s13, 4  ;;  %s482_s26 = int_to_ptr.vmem [resolvable:$false] %s481_s26 }
  0x5b   : > { %s483_s27 = scalar_lea.vmem %s482_s26, 256  ;;  %p484_p7 = scmp.lt.s32.totalorder %s734_s28, %s482_s26 }
  0x5c   : > { %p480_p5 = pneg %p479_p4  ;;  %p485_p8 = scmp.lt.s32.totalorder %s483_s27, %s477_s25 }
  0x5e   : > { %p486_p13 = por %p485_p8, %p484_p7 }
  0x60   : > { %p487_p0 = pnand %p486_p13, %p480_p5 }
  0xe7   : > { %v209_v7 = vpop.xlane.xlu0 %208  ;;  %v218_v13 = vpop.xlane.xlu1 %217 }
  0xe8   : > { %v210_v8 = vsub.f32 %v205_v4, %v209_v7 }
  0xea   : > { %v211_v9 = vmul.f32 1.442695, %v210_v8  ;;  %v219_v10 = vmul.f32 %v210_v8, %v207_v6 }
  0xec   : > { %413 = vpow2.f32 %v211_v9  ;;  %220 = vadd.xlane.f32.xlu1 %v219_v10 }
  0xf6   : > { %v414_v11 = vpop.eup %413 }
  0xf7   : > { %213 = vadd.xlane.f32.xlu0 %v414_v11 }
 0x179   : > { %v221_v17 = vpop.xlane.xlu1 %220 }
 0x184   : > { %v214_v12 = vpop.xlane.xlu0 %213 }
 0x185   : > { %415 = vlog2.f32 %v214_v12 }
 0x18f   : > { %v416_v14 = vpop.eup %415 }
 0x190   : > { %v216_v15 = vmul.f32 0.6931472, %v416_v14 }
 0x192   : > { %v222_v16 = vmul.f32 %v218_v13, %v216_v15 }
 0x194   : > { %v223_v18 = vsub.f32 %v222_v16, %v221_v17 }
 0x196   : > { %v225_v19 = vsel %vm224_vm1, %v223_v18, 0.0 }
 0x197   : > { %226 = vadd.xlane.f32.xlu0 %v225_v19 }
 0x224   : > { %v227_v20 = vpop.xlane.xlu0 %226 }
 0x225   : > { %v228_v21 = vrot.slane %v227_v20, 4 }
 0x227   : > { %v229_v22 = vadd.f32 %v228_v21, %v227_v20 }
 0x229   : > { %v230_v23 = vrot.slane %v229_v22, 2 }
 0x22b   : > { %v231_v24 = vadd.f32 %v230_v23, %v229_v22 }
 0x22d   : > { %v232_v25 = vrot.slane %v231_v24, 1 }
 0x22f   : > { %v233_v26 = vadd.f32 %v232_v25, %v231_v24 }
 0x231   : > { %360 = vpush %v233_v26 }
 0x262   : > { %s361_s16 = spop %360 }
 0x263   : > { %v235_v27 = vstv %s361_s16 }
 0x264   : > { %236 = vst [vmem:[%s195_s20] sm:$0xff] %v235_v27 }
 0x265   : > { %490 = shalt.err (!%p487_p0)
}
 0x266   : > { %s491_s5 = scalar_lea.hbm %s739_s19, 128  ;;  %s495_s30 = scalar_lea.hbm %s782_s2, 512 }
 0x267   : > { %p492_p10 = scmp.ne.s32.totalorder %s739_s19, %s491_s5  ;;  %p496_p3 = scmp.lt.u32.totalorder %s739_s19, %s782_s2 }
 0x268   : > { %p497_p9 = scmp.lt.u32.totalorder %s495_s30, %s491_s5  ;;  %p499_p12 = scmp.lt.u32.totalorder %s491_s5, %s739_s19 }
 0x269   : > { %p493_p11 = pnand %p492_p10, %p795_p2 }
 0x26a   : > { %p498_p6 = por %p497_p9, %p496_p3 }
 0x26b   : > { %p494_p1 = pneg %p493_p11 }
 0x26c   : > { %p500_p4 = por %p499_p12, %p498_p6 }
 0x26e   : > { %p501_p5 = pnand %p500_p4, %p494_p1 }
 0x270   : > { %504 = shalt.err (!%p501_p5)
}
 0x271   : > { %366 = dma.vmem_to_hbm [thread:$0]  (%p795_p2), %s734_s28, 128, %s739_s19, %s238_s23  }
 0x272 PF: > { %p380_p7 = scmp.ge.s32.totalorder %s547_s12, 2  ;;  %s263_s7 = sand.u32 1, %s535_s9  }
 0x273   : > { %p796_p8 = scmp.ne.s32.totalorder %s788_s22, 0  ;;  %s264_s14 = scalar_lea.sflag [#allocation4], %s263_s7 }
 0x275   : > { %p376_p13 = pnand %p380_p7, %p796_p8 }
 0x277   : > { %530 = dma.done.wait (!%p376_p13), %s264_s14, 128  }
 0x278   : > { %532 = vsyncadd (!%p376_p13), %s264_s14, 4294967168  ;;  %p18_p0 = scmp.ge.s32.totalorder %s592_s15, 6   ;;  %s797_s9 = smov %s539_s10 }
 0x279   : > { %s798_s10 = smov %s543_s11  ;;  %s799_s11 = smov %s604_s18 }
 0x27a   : > { %s800_s12 = smov %s592_s15  ;;  %20 = sbr.rel (!%p18_p0) target bundleno = 7 (0x7), region = 86 }
 0x281   :  { %269 = vsyncpa [#allocation3], 1 }
 0x282   :  { %271 = vsyncpa [#allocation3 + $0x1], 1 }
 0x283   :  { %272 = vsyncpa [#allocation6], 1 }
 0x284   :  { %274 = vsyncpa [#allocation6 + $0x1], 1 }
 0x285   :  { %275 = vsyncpa [#allocation4], 1 }
 0x286   :  { %277 = vsyncpa [#allocation4 + $0x1], 1 }

</bundles_post_ra>
